<compile_context>
chip_gen: v7x
topology: tpu7x:2x2x1
jax: 0.10.0
libtpu: 0.0.40
codegen_flags: <defaults>
</compile_context>

<pallas_src>
import jax
import jax.numpy as jnp
from jax.experimental import pallas as pl
from jax.experimental.pallas import tpu as pltpu


# ----------------------------- band matrices -------------------------------
def _band_matrix(n, r, dtype):
    i = jnp.arange(n)
    return (jnp.abs(i[:, None] - i[None, :]) <= r).astype(dtype)


def _block_band_matrix(g, n, r, dtype):
    """kron(I_g, band(n, r)): band-of-ones, block-diagonal over g slabs."""
    m = g * n
    i = jnp.arange(m)
    band = jnp.abs(i[:, None] - i[None, :]) <= r
    same_slab = (i[:, None] // n) == (i[None, :] // n)
    return (band & same_slab).astype(dtype)


# ------------------------------- kernel ------------------------------------
def _boxfilter_kernel(ahg_ref, aw_ref, x_ref, o_ref):
    g, h, w = x_ref.shape
    # Fuse the G batched slabs into the MXU M dimension: (G, H, W) -> (G*H, W).
    x2 = x_ref[...].reshape(g * h, w)

    # W-pass: one fused-batch matmul, M = G*H.
    t = jnp.dot(x2, aw_ref[...], preferred_element_type=jnp.float32)
    t = t.astype(aw_ref.dtype)  # bf16 MXU path when activations are bf16

    # H-pass: block-diagonal band matrix keeps M fused and avoids transposes.
    y = jnp.dot(ahg_ref[...], t, preferred_element_type=jnp.float32)

    o_ref[...] = y.reshape(g, h, w).astype(o_ref.dtype)


# ------------------------------ wrapper -------------------------------------
def _choose_group(nc, h, w, itemsize):
    """Pick how many (n,c) slabs to process per grid step."""
    budget = 24 * 1024 * 1024  # conservative: fits v7x's 64 MiB/TC scoped VMEM
    divisors = [d for d in range(1, nc + 1) if nc % d == 0]
    feasible = []
    for g in divisors:
        fused_m = g * h
        vmem = fused_m * fused_m * 4            # block-diag A_H (f32 upper bound)
        vmem += w * w * 4                       # A_W
        vmem += 2 * 2 * g * h * w * itemsize    # double-buffered in + out blocks
        vmem += fused_m * w * 4                 # f32 intermediate t
        if vmem <= budget and fused_m <= 512:
            feasible.append(g)
    g = max(feasible) if feasible else 1
    # Prefer >= 2 grid steps when possible so v7x can shard the 'parallel'
    # axis across both TensorCores (no-op on single-TC v5e / v6e).
    if nc // g < 2:
        two_step = [d for d in feasible if nc // d >= 2]
        if two_step:
            g = max(two_step)
    return g


def box_filter(x, r):
    """BoxFilter(r).forward(x) for x of shape (N, C, H, W)."""
    N, C, H, W = x.shape
    nc = N * C
    xf = x.reshape(nc, H, W)

    g = _choose_group(nc, H, W, x.dtype.itemsize)
    mat_dtype = x.dtype if x.dtype == jnp.bfloat16 else jnp.float32
    ahg = _block_band_matrix(g, H, r, mat_dtype)   # (g*H, g*H), block band
    aw = _band_matrix(W, r, mat_dtype)             # (W, W), symmetric band

    out = pl.pallas_call(
        _boxfilter_kernel,
        out_shape=jax.ShapeDtypeStruct((nc, H, W), x.dtype),
        grid_spec=pltpu.PrefetchScalarGridSpec(
            num_scalar_prefetch=0,
            grid=(nc // g,),
            in_specs=[
                pl.BlockSpec((g * H, g * H), lambda i: (0, 0)),  # A_H blockdiag, resident
                pl.BlockSpec((W, W), lambda i: (0, 0)),          # A_W, resident
                pl.BlockSpec((g, H, W), lambda i: (i, 0, 0)),    # G slabs per step
            ],
            out_specs=pl.BlockSpec((g, H, W), lambda i: (i, 0, 0)),
        ),
        compiler_params=pltpu.CompilerParams(
            dimension_semantics=("parallel",),      # shards across TCs on v7x
            vmem_limit_bytes=32 * 1024 * 1024,      # explicit, safe on 64 MiB/TC v7x
        ),
    )(ahg, aw, xf)
    return out.reshape(N, C, H, W)


# ---- pure-JAX reference mirroring the PyTorch diff_x / diff_y exactly ----
def _diff_x(inp, r):
    left = inp[:, :, r:2 * r + 1]
    middle = inp[:, :, 2 * r + 1:] - inp[:, :, :-2 * r - 1]
    right = inp[:, :, -1:] - inp[:, :, -2 * r - 1:-r - 1]
    return jnp.concatenate([left, middle, right], axis=2)


def _diff_y(inp, r):
    left = inp[:, :, :, r:2 * r + 1]
    middle = inp[:, :, :, 2 * r + 1:] - inp[:, :, :, :-2 * r - 1]
    right = inp[:, :, :, -1:] - inp[:, :, :, -2 * r - 1:-r - 1]
    return jnp.concatenate([left, middle, right], axis=3)


def box_filter_ref(x, r):
    return _diff_y(_diff_x(jnp.cumsum(x, axis=2), r).cumsum(axis=3), r)


if __name__ == "__main__":
    r = 2  # box radius (module has no learned weights)
    key = jax.random.PRNGKey(0)
    x = jax.random.normal(key, (2, 4, 16, 16), dtype=jnp.float32)

    y = box_filter(x, r)
    jax.block_until_ready(y)

    y_ref = box_filter_ref(x, r)
    assert y.shape == x.shape
    assert jnp.allclose(y, y_ref, atol=1e-4, rtol=1e-4), float(
        jnp.max(jnp.abs(y - y_ref)))
    print("KERNEL_OK")
</pallas_src>

<mosaic_0001>
module attributes {stable_mosaic.version = 11 : i64} {
  func.func @_boxfilter_kernel(%arg0: i32, %arg1: memref<64x64xf32, #tpu.memory_space<vmem>>, %arg2: memref<16x16xf32, #tpu.memory_space<vmem>>, %arg3: memref<4x16x16xf32, #tpu.memory_space<vmem>>, %arg4: memref<4x16x16xf32, #tpu.memory_space<vmem>>) attributes {dimension_semantics = [#tpu.dimension_semantics<parallel>], iteration_bounds = array<i64: 2>, scalar_prefetch = 0 : i64, scratch_operands = 0 : i64, tpu.core_type = #tpu.core_type<tc>, window_params = [{pipeline_mode = #tpu.pipeline_mode<synchronous>, transform_indices = @transform_0, window_bounds = array<i64: 64, 64>}, {pipeline_mode = #tpu.pipeline_mode<synchronous>, transform_indices = @transform_1, window_bounds = array<i64: 16, 16>}, {transform_indices = @transform_2, window_bounds = array<i64: 4, 16, 16>}, {transform_indices = @transform_3, window_bounds = array<i64: 4, 16, 16>}]} {
    %c0 = arith.constant 0 : index
    %c0_0 = arith.constant 0 : index
    %c0_1 = arith.constant 0 : index
    %0 = vector.load %arg3[%c0, %c0_0, %c0_1] : memref<4x16x16xf32, #tpu.memory_space<vmem>>, vector<4x16x16xf32>
    %1 = vector.shape_cast %0 : vector<4x16x16xf32> to vector<64x16xf32>
    %c0_2 = arith.constant 0 : index
    %c0_3 = arith.constant 0 : index
    %2 = vector.load %arg2[%c0_2, %c0_3] : memref<16x16xf32, #tpu.memory_space<vmem>>, vector<16x16xf32>
    %cst = arith.constant dense<0.000000e+00> : vector<64x16xf32>
    %3 = tpu.matmul %1, %2, %cst {dimension_numbers = #tpu.dot_dimension_numbers<[1], [0], [0], [1], [0, 0, 1, 1], [], []>} : vector<64x16xf32>, vector<16x16xf32>, vector<64x16xf32> -> vector<64x16xf32>
    %c0_4 = arith.constant 0 : index
    %c0_5 = arith.constant 0 : index
    %4 = vector.load %arg1[%c0_4, %c0_5] : memref<64x64xf32, #tpu.memory_space<vmem>>, vector<64x64xf32>
    %cst_6 = arith.constant dense<0.000000e+00> : vector<64x16xf32>
    %5 = tpu.matmul %4, %3, %cst_6 {dimension_numbers = #tpu.dot_dimension_numbers<[1], [0], [0], [1], [0, 0, 1, 1], [], []>} : vector<64x64xf32>, vector<64x16xf32>, vector<64x16xf32> -> vector<64x16xf32>
    %6 = vector.shape_cast %5 : vector<64x16xf32> to vector<4x16x16xf32>
    %c0_7 = arith.constant 0 : index
    %c0_8 = arith.constant 0 : index
    %c0_9 = arith.constant 0 : index
    %7 = vector.load %arg4[%c0_7, %c0_8, %c0_9] : memref<4x16x16xf32, #tpu.memory_space<vmem>>, vector<4x16x16xf32>
    tpu.vector_store %arg4[%c0_7, %c0_8, %c0_9], %6 {strides = array<i32>} : memref<4x16x16xf32, #tpu.memory_space<vmem>>, vector<4x16x16xf32>,
    return
  }
  func.func @transform_0(%arg0: i32) -> (i32, i32) {
    %c0_i32 = arith.constant 0 : i32
    %c0_i32_0 = arith.constant 0 : i32
    %c0_i32_1 = arith.constant 0 : i32
    return %c0_i32, %c0_i32_0 : i32, i32
  }
  func.func @transform_1(%arg0: i32) -> (i32, i32) {
    %c0_i32 = arith.constant 0 : i32
    %c0_i32_0 = arith.constant 0 : i32
    %c0_i32_1 = arith.constant 0 : i32
    return %c0_i32, %c0_i32_0 : i32, i32
  }
  func.func @transform_2(%arg0: i32) -> (i32, i32, i32) {
    %c0_i32 = arith.constant 0 : i32
    %c0_i32_0 = arith.constant 0 : i32
    %c0_i32_1 = arith.constant 0 : i32
    return %arg0, %c0_i32, %c0_i32_0 : i32, i32, i32
  }
  func.func @transform_3(%arg0: i32) -> (i32, i32, i32) {
    %c0_i32 = arith.constant 0 : i32
    %c0_i32_0 = arith.constant 0 : i32
    %c0_i32_1 = arith.constant 0 : i32
    return %arg0, %c0_i32, %c0_i32_0 : i32, i32, i32
  }
}

</mosaic_0001>

<bundles_post_ra>
// kernel: tpu_custom_call.1
= control target key start
LH: loop header
LB: loop body
LE: loop exit
PB: predicated region body
PF: predicated region fallthrough
CT: control target
= control target key end

     0   :  { %8 = vsyncpa [#allocation3], 0  ;;  %s1280_s0 = inlined_call_operand.hbm [shape: f32[64,64], index: 0, kind: input, shape index: {}]   ;;  %s1281_s1 = inlined_call_operand.hbm [shape: f32[16,16], index: 1, kind: input, shape index: {}]   ;;  %s1282_s2 = inlined_call_operand.hbm [shape: f32[8,16,16], index: 2, kind: input, shape index: {}]   ;;  %s1283_s3 = inlined_call_operand.hbm [shape: f32[8,16,16], index: 3, kind: output, shape index: {}]  }
   0x1   :  { %9 = vsyncpa [#allocation6], 0 }
   0x2   :  { %10 = vsyncpa [#allocation4], 0 }
   0x3   :  { %12 = vsyncpa [#allocation4 + $0x1], 0  ;;  %s1011_s12 = smov 0   ;;  %s1013_s13 = smov 0  }
   0x4   :  { %s1015_s14 = smov 0   ;;  %s1017_s15 = smov 0  }
   0x5 LB: > { %s1032_s16 = sadd.s32 4294967295, %s981_s15   ;;  %s612_s17 = sadd.s32 4294967294, %s981_s15   ;;  %s981_s15 = sphi %s1017_s15, %s1311_s15   ;;  %s977_s14 = sphi %s1015_s14, %s1310_s14   ;;  %s973_s13 = sphi %s1013_s13, %s1309_s13   ;;  %s969_s12 = sphi %s1011_s12, %s1308_s12  }
   0x6   : > { %s1036_s18 = sadd.s32 1, %s981_s15   ;;  %s67_s19 = sadd.s32 1, %s977_s14 }
   0x7   : > { %s64_s20 = ssub.s32 %s981_s15, %s1036_s18  ;;  %p74_p0 = scmp.ne.s32.totalorder %s977_s14, %s973_s13 }
   0x8   : > { %p65_p1 = scmp.eq.s32.totalorder %s64_s20, 0  ;;  %p75_p2 = scmp.eq.s32.totalorder %s981_s15, 0 }
   0x9   : > { %p80_p3 = scmp.ne.s32.totalorder %s973_s13, %s969_s12  ;;  %p1284_p4 = scmp.eq.s32.totalorder %s1032_s16, 0 }
   0xa   : > { %s1048_s21 = scalar_select %p65_p1, %s977_s14, %s67_s19  }
   0xb   : > { %p1050_p5 = por %p75_p2, %p74_p0  ;;  %p1056_p6 = por %p1284_p4, %p80_p3 }
   0xc   : > { %p104_p7 = scmp.eq.s32.totalorder %s1032_s16, 1  ;;  %p110_p8 = scmp.eq.s32.totalorder %s612_s17, 1 }
   0xd   : > { %s1289_s22 = scalar_select %p1050_p5, 1, 0 }
   0xe   : > { %s1290_s23 = scalar_select %p1056_p6, 1, 0 }
   0xf   : > { %p613_p9 = scmp.ge.s32.totalorder %s981_s15, 1  ;;  %p117_p10 = scmp.lt.s32.totalorder %s981_s15, 3 }
  0x10   : > { %p1063_p11 = por %p104_p7, %p74_p0  ;;  %p1067_p12 = por %p110_p8, %p80_p3 }
  0x11   : > { %p1071_p13 = pnand %p613_p9, %p117_p10  ;;  %s983_s27 = smov [#allocation2]  }
  0x12   : > { %s1291_s24 = scalar_select %p1063_p11, 1, 0 }
  0x13   : > { %s1292_s25 = scalar_select %p1067_p12, 1, 0 }
  0x14   : > { %s1293_s26 = scalar_select %p1071_p13, 1, 0 }
  0x15   : > { %p762_p1 = pneg %p1071_p13  ;;  %s129_s28 = sshll.u32 %s983_s27, 4  ;;  %s130_s28 = int_to_ptr.vmem [resolvable:$true] %s129_s28 }
  0x16   : > { %s984_s30 = smov [#allocation5]   ;;  %s821_s7 = scalar_lea.hbm %s1280_s0, 1024 }
  0x17   : > { %p1079_p2 = pnand %p762_p1, %p1284_p4  ;;  %s142_s4 = sshll.u32 %s984_s30, 4  ;;  %s143_s4 = int_to_ptr.vmem [resolvable:$true] %s142_s4 }
  0x18   : > { %p822_p7 = scmp.ne.s32.totalorder %s1280_s0, %s821_s7  ;;  %p828_p1 = scmp.lt.u32.totalorder %s821_s7, %s1280_s0 }
  0x19   : > { %p823_p8 = pneg %p1079_p2 }
  0x1b   : > { %p824_p9 = pnand %p823_p8, %p822_p7 }
  0x1d   : > { %p825_p10 = pneg %p824_p9 }
  0x1f   : > { %p830_p0 = pnand %p828_p1, %p825_p10 }
  0x21   : > { %833 = shalt.err (!%p830_p0)
}
  0x22   : > { %s834_s17 = scalar_lea.vmem %s130_s28, 1024  ;;  %p842_p11 = scmp.lt.s32.totalorder %s130_s28, %s130_s28 }
  0x23   : > { %p835_p4 = scmp.ne.s32.totalorder %s130_s28, %s834_s17  ;;  %p843_p6 = scmp.lt.s32.totalorder %s834_s17, %s834_s17 }
  0x25   : > { %p837_p3 = pnand %p835_p4, %p823_p8  ;;  %p844_p13 = por %p843_p6, %p842_p11 }
  0x27   : > { %p838_p12 = pneg %p837_p3 }
  0x29   : > { %p845_p5 = pnand %p844_p13, %p838_p12 }
  0x2b   : > { %848 = shalt.err (!%p845_p5)
}
  0x2c   : > { %s985_s19 = smov 128   ;;  %s986_s20 = smov 8  }
  0x2d   : > { %765 = dma.hbm_to_vmem [thread:$0]  (!%p1079_p2), %s1280_s0, 1024, %s130_s28, [#allocation3], %s985_s19, %s985_s19, %s986_s20  }
  0x2e   : > { %p1295_p4 = scmp.ne.s32.totalorder %s1289_s22, 0  ;;  %p1296_p0 = scmp.lt.s32.totalorder %s981_s15, 2 }
  0x2f   : > { %s849_s8 = scalar_lea.hbm %s1281_s1, 256 }
  0x30   : > { %p1114_p3 = pnand %p1296_p0, %p1295_p4  ;;  %p850_p5 = scmp.ne.s32.totalorder %s1281_s1, %s849_s8 }
  0x31   : > { %p856_p12 = scmp.lt.u32.totalorder %s849_s8, %s1281_s1 }
  0x32   : > { %s1297_s5 = scalar_select %p1114_p3, 1, 0 }
  0x33   : > { %p852_p6 = pnand %p850_p5, %p823_p8 }
  0x35   : > { %p853_p11 = pneg %p852_p6 }
  0x37   : > { %p858_p13 = pnand %p856_p12, %p853_p11 }
  0x39   : > { %861 = shalt.err (!%p858_p13)
}
  0x3a   : > { %s862_s11 = scalar_lea.vmem %s143_s4, 256  ;;  %p870_p1 = scmp.lt.s32.totalorder %s143_s4, %s143_s4 }
  0x3b   : > { %p863_p7 = scmp.ne.s32.totalorder %s143_s4, %s862_s11  ;;  %p871_p4 = scmp.lt.s32.totalorder %s862_s11, %s862_s11 }
  0x3d   : > { %p865_p9 = pnand %p863_p7, %p823_p8  ;;  %p872_p0 = por %p871_p4, %p870_p1 }
  0x3f   : > { %p866_p10 = pneg %p865_p9 }
  0x41   : > { %p873_p3 = pnand %p872_p0, %p866_p10 }
  0x43   : > { %876 = shalt.err (!%p873_p3)
}
  0x44   : > { %768 = dma.hbm_to_vmem [thread:$0]  (!%p1079_p2), %s1281_s1, 256, %s143_s4, [#allocation6], %s985_s19, %s985_s19, %s986_s20  }
  0x45   : > { %s156_s30 = sand.u32 1, %s981_s15   ;;  %s158_s6 = sand.u32 1, %s977_s14  }
  0x46   : > { %s617_s7 = sshll.u32 %s158_s6, 6  ;;  %s649_s8 = sshll.u32 %s981_s15, 10 }
  0x47   : > { %s1147_s29 = scalar_lea.hbm %s1282_s2, %s649_s8  ;;  %s160_s28 = scalar_lea.vmem [#allocation7], %s617_s7 }
  0x48   : > { %s168_s22 = sshll.u32 %s160_s28, 4  ;;  %s1151_s11 = scalar_lea.sflag [#allocation3], %s156_s30  ;;  %s1149_s22 = int_to_ptr.vmem [resolvable:$true] %s168_s22 }
  0x49   : > { %s877_s4 = scalar_lea.hbm %s1147_s29, 1024  ;;  %p1298_p8 = scmp.ne.s32.totalorder %s1297_s5, 0 }
  0x4a   : > { %p878_p2 = scmp.ne.s32.totalorder %s1147_s29, %s877_s4  ;;  %s882_s6 = scalar_lea.hbm %s1282_s2, 2048 }
  0x4b   : > { %p879_p3 = pneg %p1298_p8  ;;  %p883_p11 = scmp.lt.u32.totalorder %s1147_s29, %s1282_s2 }
  0x4c   : > { %p884_p12 = scmp.lt.u32.totalorder %s882_s6, %s877_s4  ;;  %p886_p7 = scmp.lt.u32.totalorder %s877_s4, %s1147_s29 }
  0x4d   : > { %p880_p5 = pnand %p879_p3, %p878_p2 }
  0x4e   : > { %p885_p13 = por %p884_p12, %p883_p11 }
  0x4f   : > { %p881_p6 = pneg %p880_p5 }
  0x50   : > { %p887_p9 = por %p886_p7, %p885_p13 }
  0x52   : > { %p888_p10 = pnand %p887_p9, %p881_p6 }
  0x54   : > { %891 = shalt.err (!%p888_p10)
}
  0x55   : > { %s892_s30 = scalar_lea.vmem %s1149_s22, 1024  ;;  %s987_s7 = smov [#allocation7]  }
  0x56   : > { %p893_p1 = scmp.ne.s32.totalorder %s1149_s22, %s892_s30  ;;  %s897_s10 = sshll.u32 %s987_s7, 4  ;;  %s898_s10 = int_to_ptr.vmem [resolvable:$false] %s897_s10 }
  0x57   : > { %s899_s28 = scalar_lea.vmem %s898_s10, 2048  ;;  %p900_p2 = scmp.lt.s32.totalorder %s1149_s22, %s898_s10 }
  0x58   : > { %p895_p4 = pnand %p893_p1, %p879_p3  ;;  %p901_p5 = scmp.lt.s32.totalorder %s899_s28, %s892_s30 }
  0x5a   : > { %p896_p0 = pneg %p895_p4  ;;  %p902_p11 = por %p901_p5, %p900_p2 }
  0x5c   : > { %p903_p12 = pnand %p902_p11, %p896_p0 }
  0x5e   : > { %906 = shalt.err (!%p903_p12)
}
  0x5f   : > { %772 = dma.hbm_to_vmem [thread:$0]  (!%p1298_p8), %s1147_s29, 1024, %s1149_s22, %s1151_s11, %s985_s19, %s985_s19, %s986_s20  }
  0x60   : > { %p1299_p3 = scmp.ne.s32.totalorder %s1293_s26, 0 }
  0x61   : > { %p1300_p6 = scmp.eq.s32.totalorder (!%p1299_p3), %s1032_s16, 0 }
  0x62   : > { %180 = sbr.rel (%p1299_p3) target bundleno = 588 (0x24c), region = 32 }
  0x69   : > { %952 = dma.done.wait (%p1300_p6), [#allocation3], 1024   ;;  %p1301_p13 = pmov %p1300_p6 }
  0x6a   : > { %p1302_p7 = pmov %p1300_p6 }
  0x6b   : > { %954 = vsyncadd (%p1301_p13), [#allocation3], 4294966272 }
  0x6c   : > { %956 = dma.done.wait (%p1302_p7), [#allocation6], 256   ;;  %p1303_p9 = pmov %p1300_p6 }
  0x6d   : > { %s190_s19 = sand.u32 1, %s1032_s16   ;;  %s192_s20 = sand.u32 1, %s973_s13  }
  0x6e   : > { %958 = vsyncadd (%p1303_p9), [#allocation6], 4294967040  ;;  %s1196_s26 = sshll.u32 %s192_s20, 6  ;;  %s191_s5 = scalar_lea.sflag [#allocation3], %s190_s19 }
  0x6f   : > { %s194_s29 = scalar_lea.vmem [#allocation7], %s1196_s26  ;;  %p1304_p8 = scmp.ne.s32.totalorder %s1290_s23, 0 }
  0x71   : > { %960 = dma.done.wait (%p1304_p8), %s191_s5, 1024  }
  0x72   : > { %962 = vsyncadd (%p1304_p8), %s191_s5, 4294966272  ;;  %vm229_vm0 = vcmask 130048   ;;  %v227_v0 = vld [vmem:[#allocation5] sm:$0xff]  ;;  %v228_v1 = vld [vmem:[#allocation5 + $0x8] sm:$0xff]  ;;  %vm367_vm1 = vcmask 523264   ;;  %s216_s23 = scalar_lea.vmem [#allocation8], %s1196_s26 }
  0x73   : > { %v219_v2 = vld [vmem:[%s194_s29] sm:$0xff]  ;;  %v722_v3 = vpack.c.bf16 %v228_v1, %v227_v0  ;;  %v220_v4 = vld [vmem:[%s194_s29 + $0x8] sm:$0xff]  ;;  %v221_v5 = vld [vmem:[%s194_s29 + $0x10] sm:$0xff]  ;;  %s520_s22 = sshll.u32 %s216_s23, 4  ;;  %s651_s11 = sshll.u32 %s1032_s16, 10  ;;  %s1226_s22 = int_to_ptr.vmem [resolvable:$true] %s520_s22 }
  0x74   : > { %682 = vmatprep.mubr.msk.f32.mxu0 %vm229_vm0, %v219_v2  ;;  %v222_v6 = vld [vmem:[%s194_s29 + $0x18] sm:$0xff]  ;;  %v223_v7 = vld [vmem:[%s194_s29 + $0x20] sm:$0xff]  ;;  %v224_v8 = vld [vmem:[%s194_s29 + $0x28] sm:$0xff]  ;;  %s1232_s27 = scalar_lea.hbm %s1283_s3, %s651_s11  ;;  %s1238_s16 = scalar_lea.sflag [#allocation4], %s192_s20 }
  0x75   : > { %723 = vmatprep.subr.bf16.mxu0 %v722_v3  ;;  %v225_v9 = vld [vmem:[%s194_s29 + $0x30] sm:$0xff]  ;;  %v226_v10 = vld [vmem:[%s194_s29 + $0x38] sm:$0xff]  ;;  %v361_v11 = vld [vmem:[#allocation2 + $0x10] sm:$0xff]  ;;  %s907_s6 = scalar_lea.vmem %s1226_s22, 1024  ;;  %p1305_p1 = scmp.ne.s32.totalorder %s1291_s24, 0 }
  0x76   : > { %725 = vmatpush3.bf16.msra.mxu0 %v722_v3  ;;  %713 = vmatprep.mubr.msk.f32.mxu1 %vm367_vm1, %v361_v11  ;;  %v359_v12 = vld [vmem:[#allocation2] sm:$0xff]  ;;  %v362_v25 = vld [vmem:[#allocation2 + $0x18] sm:$0xff]  ;;  %v360_v26 = vld [vmem:[#allocation2 + $0x8] sm:$0xff]  ;;  %p908_p10 = scmp.ne.s32.totalorder %s1226_s22, %s907_s6  ;;  %s988_s8 = smov [#allocation8]  }
  0x77   : > { %v363_v27 = vld [vmem:[#allocation2 + $0x20] sm:$0xff]  ;;  %v364_v28 = vld [vmem:[#allocation2 + $0x28] sm:$0xff]  ;;  %v365_v29 = vld [vmem:[#allocation2 + $0x30] sm:$0xff]  ;;  %s911_s9 = sshll.u32 %s988_s8, 4  ;;  %s912_s9 = int_to_ptr.vmem [resolvable:$false] %s911_s9 }
  0x78   : > { %v366_v30 = vld [vmem:[#allocation2 + $0x38] sm:$0xff]  ;;  %p909_p4 = pnand %p908_p10, %p1305_p1  ;;  %s913_s30 = scalar_lea.vmem %s912_s9, 2048 }
  0x79   : > { %683 = vmatmul.mubr.msk.f32.vlgmr.msra.gmra.mrb[0].mxu0 %vm229_vm0, %v220_v4  ;;  %p914_p2 = scmp.lt.s32.totalorder %s1226_s22, %s912_s9  ;;  %p915_p5 = scmp.lt.s32.totalorder %s913_s30, %s907_s6 }
  0x7a   : > { %685 = vmatprep.mubr.msk.f32.mxu0 %vm229_vm0, %v221_v5  ;;  %p910_p0 = pneg %p909_p4 }
  0x7b   : > { %p916_p11 = por %p915_p5, %p914_p2 }
  0x7d   : > { %686 = vmatmul.mubr.msk.f32.gmra.mrb[2].mxu0 %vm229_vm0, %v222_v6  ;;  %p917_p12 = pnand %p916_p11, %p910_p0 }
  0x7e   : > { %688 = vmatprep.mubr.msk.f32.mxu0 %vm229_vm0, %v223_v7 }
  0x81   : > { %689 = vmatmul.mubr.msk.f32.gmra.mrb[4].mxu0 %vm229_vm0, %v224_v8 }
  0x82   : > { %691 = vmatprep.mubr.msk.f32.mxu0 %vm229_vm0, %v225_v9 }
  0x85   : > { %692 = vmatmul.mubr.msk.f32.gmra.mrb[6].mxu0 %vm229_vm0, %v226_v10 }
  0x86   : > { %710 = vmatprep.mubr.msk.f32.mxu0 %vm367_vm1, %v359_v12 }
 0x14c   : > { %v684_v13 = vpop.f32.mrb[0].mxu0 }
 0x14d   : > { %v320_v14 = vpop.f32.mrb[1].mxu0 }
 0x14e   : > { %v726_v15 = vpack.c.bf16 %v684_v13, %v320_v14 }
 0x150   : > { %v687_v16 = vpop.f32.mrb[2].mxu0  ;;  %727 = vmatprep.subr.bf16.mxu0 %v726_v15  ;;  %742 = vmatprep.subr.bf16.mxu1 %v726_v15 }
 0x151   : > { %v330_v17 = vpop.f32.mrb[3].mxu0  ;;  %729 = vmatpush3.bf16.msra.mxu0 %v726_v15  ;;  %746 = vmatpush3.bf16.msra.mxu1 %v726_v15 }
 0x152   : > { %v730_v18 = vpack.c.bf16 %v687_v16, %v330_v17 }
 0x154   : > { %v690_v19 = vpop.f32.mrb[4].mxu0  ;;  %731 = vmatprep.subr.bf16.mxu0 %v730_v18  ;;  %743 = vmatprep.subr.bf16.mxu1 %v730_v18 }
 0x155   : > { %v340_v20 = vpop.f32.mrb[5].mxu0  ;;  %733 = vmatpush3.bf16.msra.mxu0 %v730_v18  ;;  %747 = vmatpush3.bf16.msra.mxu1 %v730_v18 }
 0x156   : > { %v734_v21 = vpack.c.bf16 %v690_v19, %v340_v20 }
 0x158   : > { %v693_v22 = vpop.f32.mrb[6].mxu0  ;;  %735 = vmatprep.subr.bf16.mxu0 %v734_v21  ;;  %744 = vmatprep.subr.bf16.mxu1 %v734_v21 }
 0x159   : > { %v350_v23 = vpop.f32.mrb[7].mxu0  ;;  %737 = vmatpush3.bf16.msra.mxu0 %v734_v21  ;;  %748 = vmatpush3.bf16.msra.mxu1 %v734_v21 }
 0x15a   : > { %v738_v24 = vpack.c.bf16 %v693_v22, %v350_v23 }
 0x15c   : > { %739 = vmatprep.subr.bf16.mxu0 %v738_v24  ;;  %745 = vmatprep.subr.bf16.mxu1 %v738_v24 }
 0x15d   : > { %741 = vmatpush3.bf16.msra.mxu0 %v738_v24  ;;  %749 = vmatpush3.bf16.msra.mxu1 %v738_v24 }
 0x160   : > { %714 = vmatmul.mubr.msk.f32.vlgmr.msra.gmra.mrb[0].mxu1 %vm367_vm1, %v362_v25  ;;  %711 = vmatmul.mubr.msk.f32.vlgmr.msra.gmra.mrb[8].mxu0 %vm367_vm1, %v360_v26 }
 0x161   : > { %716 = vmatprep.mubr.msk.f32.mxu1 %vm367_vm1, %v363_v27 }
 0x164   : > { %717 = vmatmul.mubr.msk.f32.gmra.mrb[2].mxu1 %vm367_vm1, %v364_v28 }
 0x165   : > { %719 = vmatprep.mubr.msk.f32.mxu1 %vm367_vm1, %v365_v29 }
 0x168   : > { %720 = vmatmul.mubr.msk.f32.gmra.mrb[4].mxu1 %vm367_vm1, %v366_v30 }
 0x233   : > { %v715_v31 = vpop.f32.mrb[0].mxu1  ;;  %v712_v32 = vpop.f32.mrb[8].mxu0 }
 0x234   : > { %500 = vst.msk [vmem:[%s216_s23 + $0x18] sm:$0xff] %vm229_vm0, %v715_v31  ;;  %v468_v33 = vpop.f32.mrb[1].mxu1  ;;  %498 = vst.msk [vmem:[%s216_s23 + $0x8] sm:$0xff] %vm229_vm0, %v712_v32  ;;  %v458_v34 = vpop.f32.mrb[9].mxu0 }
 0x235   : > { %499 = vst.msk [vmem:[%s216_s23 + $0x10] sm:$0xff] %vm229_vm0, %v468_v33  ;;  %497 = vst.msk [vmem:[%s216_s23] sm:$0xff] %vm229_vm0, %v458_v34 }
 0x237   : > { %v718_v35 = vpop.f32.mrb[2].mxu1 }
 0x238   : > { %502 = vst.msk [vmem:[%s216_s23 + $0x28] sm:$0xff] %vm229_vm0, %v718_v35  ;;  %v478_v36 = vpop.f32.mrb[3].mxu1 }
 0x239   : > { %501 = vst.msk [vmem:[%s216_s23 + $0x20] sm:$0xff] %vm229_vm0, %v478_v36 }
 0x23b   : > { %v721_v37 = vpop.f32.mrb[4].mxu1 }
 0x23c   : > { %504 = vst.msk [vmem:[%s216_s23 + $0x38] sm:$0xff] %vm229_vm0, %v721_v37  ;;  %v488_v38 = vpop.f32.mrb[5].mxu1 }
 0x23d   : > { %503 = vst.msk [vmem:[%s216_s23 + $0x30] sm:$0xff] %vm229_vm0, %v488_v38 }
 0x23e   : > { %920 = shalt.err (!%p917_p12)
}
 0x23f   : > { %s921_s7 = scalar_lea.hbm %s1232_s27, 1024  ;;  %s925_s19 = scalar_lea.hbm %s1283_s3, 2048 }
 0x240   : > { %p922_p3 = scmp.ne.s32.totalorder %s1232_s27, %s921_s7  ;;  %p926_p7 = scmp.lt.u32.totalorder %s1232_s27, %s1283_s3 }
 0x241   : > { %p927_p9 = scmp.lt.u32.totalorder %s925_s19, %s921_s7  ;;  %p929_p10 = scmp.lt.u32.totalorder %s921_s7, %s1232_s27 }
 0x242   : > { %p923_p6 = pnand %p922_p3, %p1305_p1 }
 0x243   : > { %p928_p8 = por %p927_p9, %p926_p7 }
 0x244   : > { %p924_p13 = pneg %p923_p6 }
 0x245   : > { %p930_p4 = por %p929_p10, %p928_p8 }
 0x247   : > { %p931_p0 = pnand %p930_p4, %p924_p13 }
 0x249   : > { %934 = shalt.err (!%p931_p0)
}
 0x24a   : > { %s989_s5 = smov 128   ;;  %s990_s29 = smov 8  }
 0x24b   : > { %760 = dma.vmem_to_hbm [thread:$0]  (%p1305_p1), %s1226_s22, 1024, %s1232_s27, %s1238_s16, %s989_s5, %s989_s5, %s990_s29  }
 0x24c PF: > { %s535_s23 = sand.u32 1, %s969_s12   ;;  %p1306_p2 = scmp.ne.s32.totalorder %s1292_s25, 0 }
 0x24d   : > { %p1307_p5 = scmp.ge.s32.totalorder %s981_s15, 2  ;;  %s536_s11 = scalar_lea.sflag [#allocation4], %s535_s23 }
 0x24f   : > { %p774_p11 = pnand %p1307_p5, %p1306_p2 }
 0x251   : > { %964 = dma.done.wait (!%p774_p11), %s536_s11, 1024  }
 0x252   : > { %966 = vsyncadd (!%p774_p11), %s536_s11, 4294966272  ;;  %p15_p12 = scmp.ge.s32.totalorder %s1036_s18, 4   ;;  %s1308_s12 = smov %s973_s13 }
 0x253   : > { %s1309_s13 = smov %s977_s14  ;;  %s1310_s14 = smov %s1048_s21 }
 0x254   : > { %s1311_s15 = smov %s1036_s18  ;;  %17 = sbr.rel (!%p15_p12) target bundleno = 5 (0x5), region = 84 }
 0x25b   :  { %541 = vsyncpa [#allocation3], 1 }
 0x25c   :  { %543 = vsyncpa [#allocation3 + $0x1], 1 }
 0x25d   :  { %544 = vsyncpa [#allocation6], 1 }
 0x25e   :  { %545 = vsyncpa [#allocation4], 1 }
 0x25f   :  { %547 = vsyncpa [#allocation4 + $0x1], 1 }

</bundles_post_ra>
